<compile_context>
chip_gen: v7x
topology: tpu7x:2x2x1
jax: 0.10.0
libtpu: 0.0.40
codegen_flags: <defaults>
</compile_context>

<pallas_src>
import functools

import jax
import jax.numpy as jnp
from jax.experimental import pallas as pl
from jax.experimental.pallas import tpu as pltpu


def _round_up(x, m):
    return ((x + m - 1) // m) * m


def _multi_task_loss_kernel(logits_ref, labels_ref, bbox_pred_ref, bbox_lab_ref,
                            out_ref, nll_acc, pos_acc, l1_acc, *,
                            n_valid, tile_n, tiles_per_split, n_tiles, guard_tail):
    p = pl.program_id(0)          # split (TensorCore) index
    i = pl.program_id(1)          # batch-tile index within the split
    t = p * tiles_per_split + i   # logical batch-tile index

    @pl.when(i == 0)
    def _init():
        nll_acc[...] = jnp.zeros_like(nll_acc)
        pos_acc[...] = jnp.zeros_like(pos_acc)
        l1_acc[...] = jnp.zeros_like(l1_acc)

    def _accumulate():
        logits = logits_ref[...].astype(jnp.float32)          # (TN, C)
        labels = labels_ref[...]                               # (TN, 1) int32
        tn, c = logits.shape

        row = jax.lax.broadcasted_iota(jnp.int32, (tn, 1), 0)
        valid = (t * tile_n + row) < n_valid                   # (TN, 1) bool

        # Stable log-softmax over the class (lane) axis.  Garbage rows of the
        # ragged last tile are zeroed before exp so inf/NaN can never leak in.
        row_max = jnp.max(logits, axis=1, keepdims=True)       # (TN, 1)
        shifted = jnp.where(valid, logits - row_max, 0.0)      # (TN, C)
        lse = jnp.log(jnp.sum(jnp.exp(shifted), axis=1, keepdims=True))   # (TN, 1)
        col = jax.lax.broadcasted_iota(jnp.int32, (tn, c), 1)
        picked = jnp.sum(jnp.where(col == labels, shifted, 0.0),
                         axis=1, keepdims=True)                # (TN, 1)

        # Fused per-row NLL partial (lse - picked) and positive-label count;
        # cross-sublane reduction is deferred to the finalize step.
        nll_acc[...] += jnp.where(valid, lse, 0.0) - picked
        pos_acc[...] += jnp.logical_and(labels > 0, valid).astype(jnp.float32)

        # Smooth-L1 (beta = 1); zero padding contributes exactly zero, so we can
        # accumulate elementwise with no per-step reduction at all.
        d = (bbox_pred_ref[...].astype(jnp.float32)
             - bbox_lab_ref[...].astype(jnp.float32))
        ad = jnp.abs(d)
        l1_acc[...] += jnp.where(ad < 1.0, 0.5 * d * d, ad - 0.5)

    if guard_tail:
        # Odd tile count split over 2 cores: the last step of one split is a
        # duplicated (index-clamped) block; skip its contribution entirely.
        pl.when(t < n_tiles)(_accumulate)
    else:
        _accumulate()

    @pl.when(i == pl.num_programs(1) - 1)
    def _finalize():
        out_ref[0, 0] = jnp.sum(nll_acc[...])   # sum of per-row NLL
        out_ref[0, 1] = jnp.sum(pos_acc[...])   # number of positive labels
        out_ref[0, 2] = jnp.sum(l1_acc[...])    # sum of smooth-L1 terms


def multi_task_loss(logits, labels, bbox_pred, bbox_labels, alpha=1.0,
                    max_tile_rows=None):
    n, c = logits.shape
    d_box = bbox_pred.shape[1]
    itemsize = jnp.dtype(logits.dtype).itemsize

    # ---- VMEM-aware tile sizing: multi-MiB logits blocks, capped per chip ----
    try:
        vmem_cap = int(pltpu.get_tpu_info().vmem_capacity_bytes)
    except Exception:
        vmem_cap = 64 << 20                      # conservative (v7x-class) fallback
    target_block_bytes = max(512 << 10, min(4 << 20, vmem_cap // 12))
    rows_by_bytes = max(8, target_block_bytes // (c * itemsize))
    row_cap = 4096
    if max_tile_rows is not None:
        row_cap = min(row_cap, int(max_tile_rows))
    tile_n = min(rows_by_bytes, row_cap)
    if tile_n >= n:
        tile_n = n                               # single full-extent tile
    else:
        tile_n = max(8, (tile_n // 8) * 8)       # sublane-aligned tile
    n_tiles = pl.cdiv(n, tile_n)

    # Split batch tiles across a leading "parallel" axis (both TensorCores on
    # v7x; a cheap sequential outer loop on single-core v5e/v6e).
    num_splits = 2 if n_tiles >= 2 else 1
    tiles_per_split = pl.cdiv(n_tiles, num_splits)
    guard_tail = (num_splits * tiles_per_split != n_tiles)

    # Labels as an (N, 1) int32 column (rows on sublanes, matching logits).
    labels2d = labels.astype(jnp.int32).reshape(n, 1)

    # Flatten bbox tensors into lane-dense zero-padded (n_tiles*bb_rows, 128) slabs.
    flat_len = n * d_box
    bb_rows = _round_up(pl.cdiv(flat_len, n_tiles * 128), 8)
    padded_flat = n_tiles * bb_rows * 128

    def _lane_dense(x):
        f = x.reshape(-1)
        f = jnp.pad(f, (0, padded_flat - flat_len))
        return f.reshape(n_tiles * bb_rows, 128)

    bbox_p = _lane_dense(bbox_pred)
    bbox_l = _lane_dense(bbox_labels)

    kernel = functools.partial(
        _multi_task_loss_kernel, n_valid=n, tile_n=tile_n,
        tiles_per_split=tiles_per_split, n_tiles=n_tiles, guard_tail=guard_tail)

    def row_map(pi, ii):
        # Clamp the (possible) padding step of an odd split; its contribution is
        # skipped inside the kernel, this just keeps the DMA in-bounds.
        return (jnp.minimum(pi * tiles_per_split + ii, n_tiles - 1), 0)

    cost = pl.CostEstimate(
        flops=6 * n * c + 8 * flat_len,
        transcendentals=n * c + n,
        bytes_accessed=(logits.size * itemsize + n * 4
                        + 2 * flat_len * jnp.dtype(bbox_pred.dtype).itemsize
                        + num_splits * 3 * 4),
    )

    # Raise the scoped-VMEM limit so the larger double-buffered blocks fit, but
    # stay under the smaller physical VMEM of v7x-class parts.
    if vmem_cap >= (128 << 20):
        vmem_limit = 64 << 20
    else:
        vmem_limit = min(48 << 20, max(32 << 20, (vmem_cap * 3) // 4))

    parts = pl.pallas_call(
        kernel,
        out_shape=jax.ShapeDtypeStruct((num_splits, 3), jnp.float32),
        grid=(num_splits, tiles_per_split),
        in_specs=[
            pl.BlockSpec((tile_n, c), row_map),        # logits (natural layout)
            pl.BlockSpec((tile_n, 1), row_map),        # labels
            pl.BlockSpec((bb_rows, 128), row_map),     # bbox_pred slab
            pl.BlockSpec((bb_rows, 128), row_map),     # bbox_labels slab
        ],
        out_specs=pl.BlockSpec((1, 3), lambda pi, ii: (pi, 0),
                               memory_space=pltpu.MemorySpace.SMEM),
        scratch_shapes=[
            pltpu.VMEM((tile_n, 1), jnp.float32),      # per-row NLL partials
            pltpu.VMEM((tile_n, 1), jnp.float32),      # per-row positive counts
            pltpu.VMEM((bb_rows, 128), jnp.float32),   # smooth-L1 partials
        ],
        compiler_params=pltpu.CompilerParams(
            dimension_semantics=("parallel", "arbitrary"),
            vmem_limit_bytes=int(vmem_limit)),
        cost_estimate=cost,
    )(logits, labels2d, bbox_p, bbox_l)

    nll_sum = jnp.sum(parts[:, 0])
    n_pos = jnp.sum(parts[:, 1])
    l1_sum = jnp.sum(parts[:, 2])
    l_cls = nll_sum / jnp.float32(n)
    l_loc = l1_sum / jnp.float32(flat_len)
    return l_cls + jnp.float32(alpha) * n_pos * l_loc


def _reference_loss(logits, labels, bbox_pred, bbox_labels, alpha=1.0):
    """Pure-JAX reference mirroring the PyTorch forward."""
    logp = jax.nn.log_softmax(logits.astype(jnp.float32), axis=-1)
    l_cls = -jnp.mean(jnp.take_along_axis(logp, labels[:, None], axis=-1))
    d = bbox_pred.astype(jnp.float32) - bbox_labels.astype(jnp.float32)
    ad = jnp.abs(d)
    l_loc = jnp.mean(jnp.where(ad < 1.0, 0.5 * d * d, ad - 0.5))
    num_pos = jnp.sum((labels > 0).astype(jnp.float32))
    return l_cls + alpha * num_pos * l_loc


if __name__ == "__main__":
    key = jax.random.PRNGKey(0)
    k1, k2, k3, k4 = jax.random.split(key, 4)

    # Small Fast R-CNN style problem: 8 ROIs, 16 classes, 4 bbox targets.
    N, C, BOX = 8, 16, 4
    logits = jax.random.normal(k1, (N, C), dtype=jnp.float32)
    labels = jax.random.randint(k2, (N,), 0, C, dtype=jnp.int32)
    bbox_pred = jax.random.normal(k3, (N, BOX), dtype=jnp.float32)
    bbox_labels = jax.random.normal(k4, (N, BOX), dtype=jnp.float32)

    loss = multi_task_loss(logits, labels, bbox_pred, bbox_labels, alpha=1.0)
    jax.block_until_ready(loss)
    ref = _reference_loss(logits, labels, bbox_pred, bbox_labels, alpha=1.0)
    assert jnp.allclose(loss, ref, rtol=1e-4, atol=1e-5), (loss, ref)

    # Second check forces small tiles to exercise the multi-tile path:
    # 2-way parallel split, ragged last tile masking, and the clamped padding
    # step (5 tiles split 2 x 3).
    N2 = 600
    k5, k6, k7, k8 = jax.random.split(jax.random.PRNGKey(1), 4)
    logits2 = jax.random.normal(k5, (N2, C), dtype=jnp.float32)
    labels2 = jax.random.randint(k6, (N2,), 0, C, dtype=jnp.int32)
    bp2 = jax.random.normal(k7, (N2, BOX), dtype=jnp.float32)
    bl2 = jax.random.normal(k8, (N2, BOX), dtype=jnp.float32)
    loss2 = multi_task_loss(logits2, labels2, bp2, bl2, alpha=0.5,
                            max_tile_rows=128)
    jax.block_until_ready(loss2)
    ref2 = _reference_loss(logits2, labels2, bp2, bl2, alpha=0.5)
    assert jnp.allclose(loss2, ref2, rtol=1e-4, atol=1e-4), (loss2, ref2)

    print("KERNEL_OK")
</pallas_src>

<mosaic_0001>
module attributes {stable_mosaic.version = 11 : i64} {
  func.func @_multi_task_loss_kernel(%arg0: i32, %arg1: i32, %arg2: memref<8x16xf32, #tpu.memory_space<vmem>>, %arg3: memref<8x1xi32, #tpu.memory_space<vmem>>, %arg4: memref<8x128xf32, #tpu.memory_space<vmem>>, %arg5: memref<8x128xf32, #tpu.memory_space<vmem>>, %arg6: memref<1x3xf32, #tpu.memory_space<smem>>, %arg7: memref<8x1xf32, #tpu.memory_space<vmem>>, %arg8: memref<8x1xf32, #tpu.memory_space<vmem>>, %arg9: memref<8x128xf32, #tpu.memory_space<vmem>>) attributes {dimension_semantics = [#tpu.dimension_semantics<parallel>, #tpu.dimension_semantics<arbitrary>], iteration_bounds = array<i64: 1, 1>, scalar_prefetch = 0 : i64, scratch_operands = 3 : i64, tpu.core_type = #tpu.core_type<tc>, window_params = [{transform_indices = @transform_0, window_bounds = array<i64: 8, 16>}, {transform_indices = @transform_1, window_bounds = array<i64: 8, 1>}, {transform_indices = @transform_2, window_bounds = array<i64: 8, 128>}, {transform_indices = @transform_3, window_bounds = array<i64: 8, 128>}, {transform_indices = @transform_4, window_bounds = array<i64: 1, 3>}]} {
    %c1_i32 = arith.constant 1 : i32
    %0 = arith.muli %arg0, %c1_i32 : i32
    %1 = arith.addi %0, %arg1 : i32
    %c0_i32 = arith.constant 0 : i32
    %2 = arith.cmpi eq, %arg1, %c0_i32 : i32
    %3 = arith.extui %2 : i1 to i32
    %c0_i32_0 = arith.constant 0 : i32
    %4 = arith.cmpi ne, %3, %c0_i32_0 : i32
    scf.if %4 {
      %cst_32 = arith.constant 0.000000e+00 : f32
      %64 = vector.broadcast %cst_32 : f32 to vector<8x1xf32>
      %c0_33 = arith.constant 0 : index
      %c0_34 = arith.constant 0 : index
      %65 = vector.load %arg7[%c0_33, %c0_34] : memref<8x1xf32, #tpu.memory_space<vmem>>, vector<8x1xf32>
      tpu.vector_store %arg7[%c0_33, %c0_34], %64 {strides = array<i32>} : memref<8x1xf32, #tpu.memory_space<vmem>>, vector<8x1xf32>,
      %cst_35 = arith.constant 0.000000e+00 : f32
      %66 = vector.broadcast %cst_35 : f32 to vector<8x1xf32>
      %c0_36 = arith.constant 0 : index
      %c0_37 = arith.constant 0 : index
      %67 = vector.load %arg8[%c0_36, %c0_37] : memref<8x1xf32, #tpu.memory_space<vmem>>, vector<8x1xf32>
      tpu.vector_store %arg8[%c0_36, %c0_37], %66 {strides = array<i32>} : memref<8x1xf32, #tpu.memory_space<vmem>>, vector<8x1xf32>,
      %cst_38 = arith.constant 0.000000e+00 : f32
      %68 = vector.broadcast %cst_38 : f32 to vector<8x128xf32>
      %c0_39 = arith.constant 0 : index
      %c0_40 = arith.constant 0 : index
      %69 = vector.load %arg9[%c0_39, %c0_40] : memref<8x128xf32, #tpu.memory_space<vmem>>, vector<8x128xf32>
      tpu.vector_store %arg9[%c0_39, %c0_40], %68 {strides = array<i32>} : memref<8x128xf32, #tpu.memory_space<vmem>>, vector<8x128xf32>,
    } else {
    }
    %c0 = arith.constant 0 : index
    %c0_1 = arith.constant 0 : index
    %5 = vector.load %arg2[%c0, %c0_1] : memref<8x16xf32, #tpu.memory_space<vmem>>, vector<8x16xf32>
    %c0_2 = arith.constant 0 : index
    %c0_3 = arith.constant 0 : index
    %6 = vector.load %arg3[%c0_2, %c0_3] : memref<8x1xi32, #tpu.memory_space<vmem>>, vector<8x1xi32>
    %7 = tpu.iota {dimensions = array<i32: 0>} : vector<8x1xi32>
    %c8_i32 = arith.constant 8 : i32
    %8 = arith.muli %1, %c8_i32 : i32
    %9 = vector.broadcast %8 : i32 to vector<8x1xi32>
    %10 = arith.addi %9, %7 : vector<8x1xi32>
    %c8_i32_4 = arith.constant 8 : i32
    %11 = vector.broadcast %c8_i32_4 : i32 to vector<8x1xi32>
    %12 = arith.cmpi slt, %10, %11 : vector<8x1xi32>
    %cst = arith.constant dense<0xFF800000> : vector<8xf32>
    %13 = vector.multi_reduction <maximumf>, %5, %cst [1] : vector<8x16xf32> to vector<8xf32>
    %14 = vector.shape_cast %13 : vector<8xf32> to vector<8x1xf32>
    %15 = vector.broadcast %14 : vector<8x1xf32> to vector<8x16xf32>
    %16 = arith.subf %5, %15 : vector<8x16xf32>
    %cst_5 = arith.constant 0.000000e+00 : f32
    %17 = vector.shape_cast %12 : vector<8x1xi1> to vector<8x1xi1>
    %18 = vector.broadcast %17 : vector<8x1xi1> to vector<8x16xi1>
    %19 = vector.broadcast %cst_5 : f32 to vector<8x16xf32>
    %20 = arith.select %18, %16, %19 : vector<8x16xi1>, vector<8x16xf32>
    %21 = math.exp %20 : vector<8x16xf32>
    %cst_6 = arith.constant dense<0.000000e+00> : vector<8xf32>
    %22 = vector.multi_reduction <add>, %21, %cst_6 [1] : vector<8x16xf32> to vector<8xf32>
    %23 = vector.shape_cast %22 : vector<8xf32> to vector<8x1xf32>
    %24 = math.log %23 : vector<8x1xf32>
    %25 = tpu.iota {dimensions = array<i32: 1>} : vector<8x16xi32>
    %26 = vector.broadcast %6 : vector<8x1xi32> to vector<8x16xi32>
    %27 = arith.cmpi eq, %25, %26 : vector<8x16xi32>
    %cst_7 = arith.constant 0.000000e+00 : f32
    %28 = vector.broadcast %cst_7 : f32 to vector<8x16xf32>
    %29 = arith.select %27, %20, %28 : vector<8x16xi1>, vector<8x16xf32>
    %cst_8 = arith.constant dense<0.000000e+00> : vector<8xf32>
    %30 = vector.multi_reduction <add>, %29, %cst_8 [1] : vector<8x16xf32> to vector<8xf32>
    %31 = vector.shape_cast %30 : vector<8xf32> to vector<8x1xf32>
    %c0_9 = arith.constant 0 : index
    %c0_10 = arith.constant 0 : index
    %32 = vector.load %arg7[%c0_9, %c0_10] : memref<8x1xf32, #tpu.memory_space<vmem>>, vector<8x1xf32>
    %cst_11 = arith.constant 0.000000e+00 : f32
    %33 = vector.broadcast %cst_11 : f32 to vector<8x1xf32>
    %34 = arith.select %12, %24, %33 : vector<8x1xi1>, vector<8x1xf32>
    %35 = arith.subf %34, %31 : vector<8x1xf32>
    %36 = arith.addf %32, %35 : vector<8x1xf32>
    %c0_12 = arith.constant 0 : index
    %c0_13 = arith.constant 0 : index
    %37 = vector.load %arg7[%c0_12, %c0_13] : memref<8x1xf32, #tpu.memory_space<vmem>>, vector<8x1xf32>
    tpu.vector_store %arg7[%c0_12, %c0_13], %36 {strides = array<i32>} : memref<8x1xf32, #tpu.memory_space<vmem>>, vector<8x1xf32>,
    %c0_14 = arith.constant 0 : index
    %c0_15 = arith.constant 0 : index
    %38 = vector.load %arg8[%c0_14, %c0_15] : memref<8x1xf32, #tpu.memory_space<vmem>>, vector<8x1xf32>
    %c0_i32_16 = arith.constant 0 : i32
    %39 = vector.broadcast %c0_i32_16 : i32 to vector<8x1xi32>
    %40 = arith.cmpi sgt, %6, %39 : vector<8x1xi32>
    %41 = arith.andi %40, %12 : vector<8x1xi1>
    %42 = arith.extui %41 : vector<8x1xi1> to vector<8x1xi32>
    %43 = arith.sitofp %42 : vector<8x1xi32> to vector<8x1xf32>
    %44 = arith.addf %38, %43 : vector<8x1xf32>
    %c0_17 = arith.constant 0 : index
    %c0_18 = arith.constant 0 : index
    %45 = vector.load %arg8[%c0_17, %c0_18] : memref<8x1xf32, #tpu.memory_space<vmem>>, vector<8x1xf32>
    tpu.vector_store %arg8[%c0_17, %c0_18], %44 {strides = array<i32>} : memref<8x1xf32, #tpu.memory_space<vmem>>, vector<8x1xf32>,
    %c0_19 = arith.constant 0 : index
    %c0_20 = arith.constant 0 : index
    %46 = vector.load %arg4[%c0_19, %c0_20] : memref<8x128xf32, #tpu.memory_space<vmem>>, vector<8x128xf32>
    %c0_21 = arith.constant 0 : index
    %c0_22 = arith.constant 0 : index
    %47 = vector.load %arg5[%c0_21, %c0_22] : memref<8x128xf32, #tpu.memory_space<vmem>>, vector<8x128xf32>
    %48 = arith.subf %46, %47 : vector<8x128xf32>
    %49 = math.absf %48 : vector<8x128xf32>
    %c0_23 = arith.constant 0 : index
    %c0_24 = arith.constant 0 : index
    %50 = vector.load %arg9[%c0_23, %c0_24] : memref<8x128xf32, #tpu.memory_space<vmem>>, vector<8x128xf32>
    %cst_25 = arith.constant 1.000000e+00 : f32
    %51 = vector.broadcast %cst_25 : f32 to vector<8x128xf32>
    %52 = arith.cmpf olt, %49, %51 : vector<8x128xf32>
    %cst_26 = arith.constant 5.000000e-01 : f32
    %53 = vector.broadcast %cst_26 : f32 to vector<8x128xf32>
    %54 = arith.mulf %53, %48 : vector<8x128xf32>
    %55 = arith.mulf %54, %48 : vector<8x128xf32>
    %cst_27 = arith.constant 5.000000e-01 : f32
    %56 = vector.broadcast %cst_27 : f32 to vector<8x128xf32>
    %57 = arith.subf %49, %56 : vector<8x128xf32>
    %58 = arith.select %52, %55, %57 : vector<8x128xi1>, vector<8x128xf32>
    %59 = arith.addf %50, %58 : vector<8x128xf32>
    %c0_28 = arith.constant 0 : index
    %c0_29 = arith.constant 0 : index
    %60 = vector.load %arg9[%c0_28, %c0_29] : memref<8x128xf32, #tpu.memory_space<vmem>>, vector<8x128xf32>
    tpu.vector_store %arg9[%c0_28, %c0_29], %59 {strides = array<i32>} : memref<8x128xf32, #tpu.memory_space<vmem>>, vector<8x128xf32>,
    %c0_i32_30 = arith.constant 0 : i32
    %61 = arith.cmpi eq, %arg1, %c0_i32_30 : i32
    %62 = arith.extui %61 : i1 to i32
    %c0_i32_31 = arith.constant 0 : i32
    %63 = arith.cmpi ne, %62, %c0_i32_31 : i32
    scf.if %63 {
      %c0_32 = arith.constant 0 : index
      %c0_33 = arith.constant 0 : index
      %64 = vector.load %arg7[%c0_32, %c0_33] : memref<8x1xf32, #tpu.memory_space<vmem>>, vector<8x1xf32>
      %65 = vector.shape_cast %64 : vector<8x1xf32> to vector<1x8x1xf32>
      %cst_34 = arith.constant dense<0.000000e+00> : vector<1xf32>
      %66 = vector.multi_reduction <add>, %65, %cst_34 [1, 2] : vector<1x8x1xf32> to vector<1xf32>
      %67 = vector.shape_cast %66 : vector<1xf32> to vector<1x1x1xf32>
      %68 = vector.extract %67[0, 0, 0] : f32 from vector<1x1x1xf32>
      %c0_35 = arith.constant 0 : index
      %c0_36 = arith.constant 0 : index
      %69 = memref.load %arg6[%c0_35, %c0_36] : memref<1x3xf32, #tpu.memory_space<smem>>
      memref.store %68, %arg6[%c0_35, %c0_36] : memref<1x3xf32, #tpu.memory_space<smem>>
      %c0_37 = arith.constant 0 : index
      %c0_38 = arith.constant 0 : index
      %70 = vector.load %arg8[%c0_37, %c0_38] : memref<8x1xf32, #tpu.memory_space<vmem>>, vector<8x1xf32>
      %71 = vector.shape_cast %70 : vector<8x1xf32> to vector<1x8x1xf32>
      %cst_39 = arith.constant dense<0.000000e+00> : vector<1xf32>
      %72 = vector.multi_reduction <add>, %71, %cst_39 [1, 2] : vector<1x8x1xf32> to vector<1xf32>
      %73 = vector.shape_cast %72 : vector<1xf32> to vector<1x1x1xf32>
      %74 = vector.extract %73[0, 0, 0] : f32 from vector<1x1x1xf32>
      %c0_40 = arith.constant 0 : index
      %c1 = arith.constant 1 : index
      %75 = memref.load %arg6[%c0_40, %c1] : memref<1x3xf32, #tpu.memory_space<smem>>
      memref.store %74, %arg6[%c0_40, %c1] : memref<1x3xf32, #tpu.memory_space<smem>>
      %c0_41 = arith.constant 0 : index
      %c0_42 = arith.constant 0 : index
      %76 = vector.load %arg9[%c0_41, %c0_42] : memref<8x128xf32, #tpu.memory_space<vmem>>, vector<8x128xf32>
      %77 = vector.shape_cast %76 : vector<8x128xf32> to vector<1x8x128xf32>
      %cst_43 = arith.constant dense<0.000000e+00> : vector<1xf32>
      %78 = vector.multi_reduction <add>, %77, %cst_43 [1, 2] : vector<1x8x128xf32> to vector<1xf32>
      %79 = vector.shape_cast %78 : vector<1xf32> to vector<1x1x1xf32>
      %80 = vector.extract %79[0, 0, 0] : f32 from vector<1x1x1xf32>
      %c0_44 = arith.constant 0 : index
      %c2 = arith.constant 2 : index
      %81 = memref.load %arg6[%c0_44, %c2] : memref<1x3xf32, #tpu.memory_space<smem>>
      memref.store %80, %arg6[%c0_44, %c2] : memref<1x3xf32, #tpu.memory_space<smem>>
    } else {
    }
    return
  }
  func.func @transform_0(%arg0: i32, %arg1: i32) -> (i32, i32) {
    %c1_i32 = arith.constant 1 : i32
    %0 = arith.muli %arg0, %c1_i32 : i32
    %1 = arith.addi %0, %arg1 : i32
    %c0_i32 = arith.constant 0 : i32
    %2 = arith.minsi %1, %c0_i32 : i32
    %c0_i32_0 = arith.constant 0 : i32
    %c0_i32_1 = arith.constant 0 : i32
    return %2, %c0_i32_0 : i32, i32
  }
  func.func @transform_1(%arg0: i32, %arg1: i32) -> (i32, i32) {
    %c1_i32 = arith.constant 1 : i32
    %0 = arith.muli %arg0, %c1_i32 : i32
    %1 = arith.addi %0, %arg1 : i32
    %c0_i32 = arith.constant 0 : i32
    %2 = arith.minsi %1, %c0_i32 : i32
    %c0_i32_0 = arith.constant 0 : i32
    %c0_i32_1 = arith.constant 0 : i32
    return %2, %c0_i32_0 : i32, i32
  }
  func.func @transform_2(%arg0: i32, %arg1: i32) -> (i32, i32) {
    %c1_i32 = arith.constant 1 : i32
    %0 = arith.muli %arg0, %c1_i32 : i32
    %1 = arith.addi %0, %arg1 : i32
    %c0_i32 = arith.constant 0 : i32
    %2 = arith.minsi %1, %c0_i32 : i32
    %c0_i32_0 = arith.constant 0 : i32
    %c0_i32_1 = arith.constant 0 : i32
    return %2, %c0_i32_0 : i32, i32
  }
  func.func @transform_3(%arg0: i32, %arg1: i32) -> (i32, i32) {
    %c1_i32 = arith.constant 1 : i32
    %0 = arith.muli %arg0, %c1_i32 : i32
    %1 = arith.addi %0, %arg1 : i32
    %c0_i32 = arith.constant 0 : i32
    %2 = arith.minsi %1, %c0_i32 : i32
    %c0_i32_0 = arith.constant 0 : i32
    %c0_i32_1 = arith.constant 0 : i32
    return %2, %c0_i32_0 : i32, i32
  }
  func.func @transform_4(%arg0: i32, %arg1: i32) -> (i32, i32) {
    %c0_i32 = arith.constant 0 : i32
    %c0_i32_0 = arith.constant 0 : i32
    return %arg0, %c0_i32 : i32, i32
  }
}

</mosaic_0001>

<bundles_post_ra>
// kernel: tpu_custom_call.1
= control target key start
LH: loop header
LB: loop body
LE: loop exit
PB: predicated region body
PF: predicated region fallthrough
CT: control target
= control target key end

     0   :  { %9 = vsyncpa [#allocation6], 0  ;;  %s385_s0 = inlined_call_operand.vmem [shape: f32[8,16], index: 0, kind: input, shape index: {}]   ;;  %s386_s1 = inlined_call_operand.vmem [shape: s32[8,1], index: 1, kind: input, shape index: {}]   ;;  %s387_s2 = inlined_call_operand.vmem [shape: f32[8,128], index: 2, kind: input, shape index: {}]   ;;  %s388_s3 = inlined_call_operand.hbm [shape: f32[8,128], index: 3, kind: input, shape index: {}]   ;;  %s389_s4 = inlined_call_operand.hbm [shape: f32[1,3], index: 4, kind: output, shape index: {}]  }
   0x1   :  { %10 = vsyncpa [#allocation7], 0  ;;  %s314_s15 = smov [#allocation5]   ;;  %s278_s19 = scalar_lea.hbm %s388_s3, 128 }
   0x2   :  { %s58_s16 = sshll.u32 %s314_s15, 4  ;;  %p279_p0 = scmp.ne.s32.totalorder %s388_s3, %s278_s19  ;;  %s59_s16 = int_to_ptr.vmem [resolvable:$true] %s58_s16 }
   0x3   :  { %p282_p1 = scmp.lt.u32.totalorder %s278_s19, %s388_s3 }
   0x5   :  { %p284_p2 = pnand %p282_p1, %p279_p0 }
   0x7   :  { %287 = shalt.err (!%p284_p2)
}
   0x8   :  { %s288_s24 = scalar_lea.vmem %s59_s16, 128  ;;  %p293_p4 = scmp.lt.s32.totalorder %s59_s16, %s59_s16 }
   0x9   :  { %p289_p3 = scmp.ne.s32.totalorder %s59_s16, %s288_s24  ;;  %p294_p5 = scmp.lt.s32.totalorder %s288_s24, %s288_s24 }
   0xb   :  { %p295_p6 = por %p294_p5, %p293_p4 }
   0xd   :  { %p296_p7 = pnand %p295_p6, %p289_p3 }
   0xf   :  { %299 = shalt.err (!%p296_p7)
}
  0x10   :  { %61 = dma.hbm_to_vmem [thread:$0]  %s388_s3, 128, %s59_s16, [#allocation6]  }
  0x11   :  { %310 = dma.done.wait [#allocation6], 128  }
  0x12   :  { %311 = vsyncadd [#allocation6], 4294967168  ;;  %vm124_vm0 = vcmask 7168   ;;  %v315_v0 = vmov 0   ;;  %v316_v1 = vmov 0.0   ;;  %vm136_vm1 = vcmask 130048  }
  0x13   :  { %273 = vset.pattern.permute.xlu0 %v315_v0  ;;  %125 = vst.msk [vmem:[#allocation2] sm:$0xff] %vm124_vm0, %v316_v1  ;;  %126 = vst.msk [vmem:[#allocation3] sm:$0xff] %vm124_vm0, %v316_v1  ;;  %v128_v2 = vld [vmem:[%s385_s0] sm:$0xff]  ;;  %v151_v11 = vlaneseq  ;;  %v175_v26 = vld [vmem:[#allocation5] sm:$0xff]  ;;  %s300_s8 = scalar_lea.hbm %s389_s4, 16 }
  0x14   :  { %v129_v3 = vld [vmem:[%s386_s1] sm:$0xff]  ;;  %v137_v4 = vsel %vm136_vm1, %v128_v2, -inf  ;;  %p301_p8 = scmp.ne.s32.totalorder %s389_s4, %s300_s8  ;;  %p304_p9 = scmp.lt.u32.totalorder %s300_s8, %s389_s4 }
  0x15   :  { %vm168_vm2 = vcmp.gt.s32.totalorder %v129_v3, 0  ;;  %138 = vmax.xlane.f32.xlu0 %v137_v4  ;;  %v152_v12 = vand.u32 127, %v151_v11  ;;  %v174_v25 = vld [vmem:[%s387_s2] sm:$0xff] }
  0x16   :  { %v261_v6 = vsel %vm168_vm2, 1.0, %v316_v1  ;;  %v176_v29 = vsub.f32 %v174_v25, %v175_v26  ;;  %p306_p10 = pnand %p304_p9, %p301_p8 }
  0x18   :  { %v177_v30 = vand.u32 2147483647, %v176_v29  ;;  %v180_v31 = vmul.f32 0.5, %v176_v29 }
  0x1a   :  { %v167_v5 = vld [vmem:[#allocation3] sm:$0xff]  ;;  %v161_v24 = vld [vmem:[#allocation2] sm:$0xff]  ;;  %v181_v32 = vmul.f32 %v180_v31, %v176_v29  ;;  %v262_v33 = vadd.f32 -0.5, %v177_v30  ;;  %vm179_vm4 = vcmp.lt.f32.partialorder %v177_v30, 1.0 }
  0x1b   :  { %v172_v7 = vadd.f32 %v261_v6, %v167_v5 }
  0x1c   :  { %v183_v36 = vsel %vm179_vm4, %v181_v32, %v262_v33 }
  0x1d   :  { %173 = vst.msk [vmem:[#allocation3] sm:$0xff] %vm124_vm0, %v172_v7 }
  0x24   :  { %v202_v18 = vld [vmem:[#allocation3] sm:$0xff] }
  0x25   :  { %v203_v19 = vsel %vm124_vm0, %v202_v18, 0.0 }
  0x2b   :  { %154 = vperm.xlu0 %273, %v129_v3  }
  0xa2   :  { %v139_v8 = vpop.xlane.xlu0 %138 }
  0xa3   :  { %v140_v9 = vsub.f32 %v128_v2, %v139_v8 }
  0xa5   :  { %v144_v10 = vmul.f32 1.442695, %v140_v9 }
  0xa7   :  { %274 = vpow2.f32 %v144_v10 }
  0xaa   :  { %v155_v13 = vpop.permute.xlu0 %154 }
  0xab   :  { %vm156_vm3 = vcmp.eq.s32.totalorder %v152_v12, %v155_v13 }
  0xac   :  { %v157_v16 = vsel %vm156_vm3, %v140_v9, 0.0 }
  0xad   :  { %v158_v17 = vsel %vm136_vm1, %v157_v16, 0.0 }
  0xb1   :  { %v275_v14 = vpop.eup %274 }
  0xb2   :  { %v146_v15 = vsel %vm136_vm1, %v275_v14, 0.0 }
  0xb3   :  { %147 = vadd.xlane.f32.xlu1 %v146_v15 }
  0xb7   :  { %159 = vadd.xlane.f32.xlu1 %v158_v17 }
  0xbb   :  { %204 = vadd.xlane.f32.xlu1 %v203_v19 }
 0x140   :  { %v148_v20 = vpop.xlane.xlu1 %147 }
 0x141   :  { %276 = vlog2.f32 %v148_v20 }
 0x144   :  { %v160_v23 = vpop.xlane.xlu1 %159 }
 0x148   :  { %v205_v37 = vpop.xlane.xlu1 %204 }
 0x149   :  { %v206_v38 = vrot.slane %v205_v37, 4 }
 0x14b   :  { %v277_v21 = vpop.eup %276  ;;  %v207_v39 = vadd.f32 %v206_v38, %v205_v37 }
 0x14c   :  { %v150_v22 = vmul.f32 0.6931472, %v277_v21 }
 0x14d   :  { %v208_v40 = vrot.slane %v207_v39, 2 }
 0x14e   :  { %v163_v27 = vsub.f32 %v150_v22, %v160_v23 }
 0x14f   :  { %v209_v45 = vadd.f32 %v208_v40, %v207_v39 }
 0x150   :  { %v164_v28 = vadd.f32 %v163_v27, %v161_v24 }
 0x151   :  { %v210_v50 = vrot.slane %v209_v45, 1 }
 0x152   :  { %166 = vst.msk [vmem:[#allocation2] sm:$0xff] %vm124_vm0, %v164_v28 }
 0x153   :  { %v211_v55 = vadd.f32 %v210_v50, %v209_v45 }
 0x159   :  { %v189_v34 = vld [vmem:[#allocation2] sm:$0xff] }
 0x15a   :  { %v190_v35 = vsel %vm124_vm0, %v189_v34, 0.0 }
 0x15b   :  { %191 = vadd.xlane.f32.xlu1 %v190_v35 }
 0x15f   :  { %216 = vadd.xlane.f32.xlu1 %v183_v36 }
 0x1e8   :  { %v192_v41 = vpop.xlane.xlu1 %191 }
 0x1e9   :  { %v193_v42 = vrot.slane %v192_v41, 4 }
 0x1eb   :  { %v194_v43 = vadd.f32 %v193_v42, %v192_v41 }
 0x1ec   :  { %v217_v44 = vpop.xlane.xlu1 %216 }
 0x1ed   :  { %v195_v46 = vrot.slane %v194_v43, 2  ;;  %v218_v47 = vrot.slane %v217_v44, 4 }
 0x1ef   :  { %v219_v48 = vadd.f32 %v218_v47, %v217_v44  ;;  %v196_v49 = vadd.f32 %v195_v46, %v194_v43 }
 0x1f1   :  { %v220_v51 = vrot.slane %v219_v48, 2  ;;  %v197_v52 = vrot.slane %v196_v49, 1 }
 0x1f3   :  { %v221_v53 = vadd.f32 %v220_v51, %v219_v48  ;;  %v198_v54 = vadd.f32 %v197_v52, %v196_v49 }
 0x1f5   :  { %263 = vpush %v198_v54  ;;  %v222_v56 = vrot.slane %v221_v53, 1 }
 0x1f6   :  { %265 = vpush %v211_v55 }
 0x1f7   :  { %v223_v57 = vadd.f32 %v222_v56, %v221_v53 }
 0x1f9   :  { %267 = vpush %v223_v57 }
 0x226   :  { %s264_s2 = spop %263 }
 0x227   :  { %201 = sst [smem:[#allocation8]] %s264_s2  ;;  %s266_s3 = spop %265 }
 0x228   :  { %214 = sst [smem:[#allocation8 + $0x1]] %s266_s3 }
 0x22a   :  { %s268_s5 = spop %267 }
 0x22b   :  { %226 = sst [smem:[#allocation8 + $0x2]] %s268_s5 }
 0x22c   :  { %309 = shalt.err (!%p306_p10)
}
 0x22d   :  { %s317_s13 = smov [#allocation8]  }
 0x22e   :  { %234 = dma.smem_to_hbm %s317_s13, 16, %s389_s4, [#allocation7]  }
 0x22f   :  { %312 = dma.done.wait [#allocation7], 16  }
 0x230   :  { %313 = vsyncadd [#allocation7], 4294967280 }
 0x231   :  { %238 = sfence }
 0x232   :  { %239 = vsyncpa [#allocation6], 1 }
 0x233   :  { %240 = vsyncpa [#allocation7], 1 }

</bundles_post_ra>
